<compile_context>
chip_gen: v7x
topology: tpu7x:2x2x1
jax: 0.10.0
libtpu: 0.0.40
codegen_flags: <defaults>
</compile_context>

<pallas_src>
import math

import jax
import jax.numpy as jnp
from jax.experimental import pallas as pl
from jax.experimental.pallas import tpu as pltpu


def _round_up(x, m):
    return ((x + m - 1) // m) * m


def _vmem_capacity_bytes():
    """Per-core VMEM capacity; conservative 64 MiB (v7x) fallback."""
    try:
        return int(pltpu.get_tpu_info().vmem_capacity_bytes)
    except Exception:
        return 64 * 1024 * 1024


def _make_wn_kernel(has_bias):
    """Tiled matmul with per-output-channel scale (+ optional bias) at K-finalize."""

    def kernel(x_ref, wt_ref, inv_ref, *rest):
        if has_bias:
            b_ref, o_ref, acc_ref = rest
        else:
            b_ref = None
            o_ref, acc_ref = rest

        k = pl.program_id(2)

        @pl.when(k == 0)
        def _():
            acc_ref[...] = jnp.zeros_like(acc_ref)

        # MXU hot path: (tm, tk) @ (tk, tn) with f32 accumulation.
        acc_ref[...] += jnp.dot(x_ref[...], wt_ref[...],
                                preferred_element_type=jnp.float32)

        @pl.when(k == pl.num_programs(2) - 1)
        def _():
            out = acc_ref[...] * inv_ref[...]          # (tm,tn) * (1,tn) f32
            if has_bias:
                out = out + b_ref[...]
            o_ref[...] = out.astype(o_ref.dtype)

    return kernel


def prepare_wn_params(weight, scale=None, bias=None, *,
                      compute_dtype=jnp.bfloat16, tn=None, tk=None,
                      vmem_budget_bytes=None):
    """One-time parameter preprocessing.  Cache & reuse the result across calls.

    weight: (out_features, in_features); scale: (out_features, 1) or None;
    bias: (out_features,) or None.
    """
    out_f, in_f = weight.shape
    eb = jnp.dtype(compute_dtype).itemsize

    if vmem_budget_bytes is None:
        vmem_budget_bytes = int(0.55 * _vmem_capacity_bytes())

    # ---- tile sizes: tn over outputs, tk over the reduction (K) -----------
    if tn is None:
        tn = min(512, _round_up(out_f, 128))
    k128 = _round_up(in_f, 128)
    if tk is None:
        tm_ref = 512  # batch-tile assumption for VMEM budgeting
        fixed = 3 * tm_ref * tn * 4 + 4 * tn * 4          # out (dbl-buf) + f32 acc + rows
        per_k = 2 * (tm_ref + tn) * eb                    # dbl-buffered x & w.T per K elem
        tk_cap = max(128, ((vmem_budget_bytes - fixed) // per_k) // 128 * 128)
        tk = min(k128, tk_cap)                            # full-K residency when it fits

    # ---- exact f32 inv_norm and padded, pre-transposed operands -----------
    w32 = weight.astype(jnp.float32)
    inv = 1.0 / jnp.sqrt(jnp.sum(w32 * w32, axis=1) + 1e-6)       # (out,)
    if scale is not None:
        inv = inv * scale.reshape(out_f).astype(jnp.float32)

    n_p = _round_up(out_f, tn)
    k_p = _round_up(in_f, tk)

    w_t = jnp.pad(weight.T.astype(compute_dtype),
                  ((0, k_p - in_f), (0, n_p - out_f)))            # (K_p, N_p)
    inv_row = jnp.pad(inv.reshape(1, out_f), ((0, 0), (0, n_p - out_f)))
    bias_row = None
    if bias is not None:
        bias_row = jnp.pad(bias.reshape(1, out_f).astype(jnp.float32),
                           ((0, 0), (0, n_p - out_f)))

    return dict(w_t=w_t, inv=inv_row, bias=bias_row,
                out_features=out_f, in_features=in_f,
                tn=tn, tk=tk, compute_dtype=compute_dtype)


def weight_normalized_linear(x, weight=None, scale=None, bias=None, *,
                             params=None, compute_dtype=jnp.bfloat16,
                             tm=None, buffer_count=None, vmem_limit_bytes=None):
    """Forward pass of WeightNormalizedLinear.  Returns (..., out_features) in x.dtype.

    For repeated calls, build `params = prepare_wn_params(...)` once and pass it.
    """
    if params is None:
        params = prepare_wn_params(weight, scale, bias, compute_dtype=compute_dtype)

    in_f = params["in_features"]
    out_f = params["out_features"]
    tn, tk = params["tn"], params["tk"]
    w_t, inv_row, bias_row = params["w_t"], params["inv"], params["bias"]
    mxu_dtype = params["compute_dtype"]

    orig_shape = x.shape
    x2 = x.reshape(-1, in_f)
    B = x2.shape[0]

    # ---- batch tile: minimize padding waste --------------------------------
    if tm is None:
        if B <= 512:
            tm = _round_up(B, 8)
        else:
            cands = (512, 448, 384, 320, 256, 192, 128)
            tm = min(cands, key=lambda t: (_round_up(B, t) - B, -t))

    k_p, n_p = w_t.shape
    b_p = _round_up(B, tm)

    # v7x has 2 TensorCores: make sure at least 2 parallel blocks exist.
    if (b_p // tm) * (n_p // tn) < 2 and tn >= 256 and (tn // 2) % 128 == 0:
        tn //= 2

    x_p = jnp.pad(x2.astype(mxu_dtype), ((0, b_p - B), (0, k_p - in_f)))

    grid = (b_p // tm, n_p // tn, k_p // tk)

    def stream_spec(shape, index_map):
        if buffer_count is not None and buffer_count != 2:
            return pl.BlockSpec(shape, index_map,
                                pipeline_mode=pl.Buffered(buffer_count))
        return pl.BlockSpec(shape, index_map)

    in_specs = [
        stream_spec((tm, tk), lambda i, j, k: (i, k)),   # x tile
        stream_spec((tk, tn), lambda i, j, k: (k, j)),   # w.T tile
        pl.BlockSpec((1, tn), lambda i, j, k: (0, j)),   # inv_norm row (f32)
    ]
    args = [x_p, w_t, inv_row]
    if bias_row is not None:
        in_specs.append(pl.BlockSpec((1, tn), lambda i, j, k: (0, j)))
        args.append(bias_row)

    if vmem_limit_bytes is None:
        vmem_limit_bytes = min(int(0.85 * _vmem_capacity_bytes()),
                               112 * 1024 * 1024)

    out = pl.pallas_call(
        _make_wn_kernel(bias_row is not None),
        out_shape=jax.ShapeDtypeStruct((b_p, n_p), x.dtype),
        grid_spec=pltpu.PrefetchScalarGridSpec(
            num_scalar_prefetch=0,
            grid=grid,
            in_specs=in_specs,
            out_specs=pl.BlockSpec((tm, tn), lambda i, j, k: (i, j)),
            scratch_shapes=[pltpu.VMEM((tm, tn), jnp.float32)],
        ),
        compiler_params=pltpu.CompilerParams(
            dimension_semantics=("parallel", "parallel", "arbitrary"),
            vmem_limit_bytes=vmem_limit_bytes,
        ),
    )(*args)

    out = out[:B, :out_f]
    return out.reshape(orig_shape[:-1] + (out_f,))


def reference(x, weight, scale, bias):
    norm = jnp.sqrt(jnp.sum(weight * weight, axis=1, keepdims=True) + 1e-6)
    if scale is not None:
        norm = norm / scale
    nw = weight / norm
    out = x @ nw.T
    if bias is not None:
        out = out + bias[None, :]
    return out


if __name__ == "__main__":
    batch, in_features, out_features = 16, 32, 64

    key = jax.random.PRNGKey(0)
    kx, kw, kb = jax.random.split(key, 3)

    # Deterministic parameter init matching reset_parameters(init_factor=1):
    stdv = 1.0 / math.sqrt(in_features)
    weight = jax.random.uniform(
        kw, (out_features, in_features), jnp.float32, minval=-stdv, maxval=stdv)
    bias = jax.random.uniform(
        kb, (out_features,), jnp.float32, minval=-stdv, maxval=stdv)
    scale = jnp.ones((out_features, 1), jnp.float32)
    x = jax.random.normal(kx, (batch, in_features), jnp.float32)

    ref = reference(x, weight, scale, bias)

    # Exact f32 MXU path: tight tolerance.
    out_f32 = jax.block_until_ready(
        weight_normalized_linear(x, weight, scale, bias,
                                 compute_dtype=jnp.float32))
    assert out_f32.shape == (batch, out_features)
    assert jnp.allclose(out_f32, ref, atol=1e-5, rtol=1e-5)

    # Default bf16 MXU path (f32 accumulation): bf16-input rounding tolerance.
    out_bf = jax.block_until_ready(
        weight_normalized_linear(x, weight, scale, bias))
    assert out_bf.shape == (batch, out_features)
    assert jnp.allclose(out_bf, ref, atol=5e-2, rtol=5e-2)

    # No-bias / no-scale path (bias DMA and add are skipped entirely).
    out_nb = jax.block_until_ready(
        weight_normalized_linear(x, weight, None, None,
                                 compute_dtype=jnp.float32))
    assert jnp.allclose(out_nb, reference(x, weight, None, None),
                        atol=1e-5, rtol=1e-5)

    # Cached-params path (weight preprocessing done once, reused).
    prep = prepare_wn_params(weight, scale, bias, compute_dtype=jnp.float32)
    out_cached = jax.block_until_ready(
        weight_normalized_linear(x, params=prep))
    assert jnp.allclose(out_cached, ref, atol=1e-5, rtol=1e-5)

    print("KERNEL_OK")
</pallas_src>

<mosaic_0001>
module attributes {stable_mosaic.version = 11 : i64} {
  func.func @kernel(%arg0: i32, %arg1: i32, %arg2: i32, %arg3: memref<16x128xf32, #tpu.memory_space<vmem>>, %arg4: memref<128x128xf32, #tpu.memory_space<vmem>>, %arg5: memref<1x128xf32, #tpu.memory_space<vmem>>, %arg6: memref<1x128xf32, #tpu.memory_space<vmem>>, %arg7: memref<16x128xf32, #tpu.memory_space<vmem>>, %arg8: memref<16x128xf32, #tpu.memory_space<vmem>>) attributes {dimension_semantics = [#tpu.dimension_semantics<parallel>, #tpu.dimension_semantics<parallel>, #tpu.dimension_semantics<arbitrary>], iteration_bounds = array<i64: 1, 1, 1>, scalar_prefetch = 0 : i64, scratch_operands = 1 : i64, tpu.core_type = #tpu.core_type<tc>, window_params = [{transform_indices = @transform_0, window_bounds = array<i64: 16, 128>}, {transform_indices = @transform_1, window_bounds = array<i64: 128, 128>}, {transform_indices = @transform_2, window_bounds = array<i64: 1, 128>}, {transform_indices = @transform_3, window_bounds = array<i64: 1, 128>}, {transform_indices = @transform_4, window_bounds = array<i64: 16, 128>}]} {
    %c0_i32 = arith.constant 0 : i32
    %0 = arith.cmpi eq, %arg2, %c0_i32 : i32
    %1 = arith.extui %0 : i1 to i32
    %c0_i32_0 = arith.constant 0 : i32
    %2 = arith.cmpi ne, %1, %c0_i32_0 : i32
    scf.if %2 {
      %cst_10 = arith.constant 0.000000e+00 : f32
      %12 = vector.broadcast %cst_10 : f32 to vector<16x128xf32>
      %c0_11 = arith.constant 0 : index
      %c0_12 = arith.constant 0 : index
      %13 = vector.load %arg8[%c0_11, %c0_12] : memref<16x128xf32, #tpu.memory_space<vmem>>, vector<16x128xf32>
      tpu.vector_store %arg8[%c0_11, %c0_12], %12 {strides = array<i32>} : memref<16x128xf32, #tpu.memory_space<vmem>>, vector<16x128xf32>,
    } else {
    }
    %c0 = arith.constant 0 : index
    %c0_1 = arith.constant 0 : index
    %3 = vector.load %arg8[%c0, %c0_1] : memref<16x128xf32, #tpu.memory_space<vmem>>, vector<16x128xf32>
    %c0_2 = arith.constant 0 : index
    %c0_3 = arith.constant 0 : index
    %4 = vector.load %arg3[%c0_2, %c0_3] : memref<16x128xf32, #tpu.memory_space<vmem>>, vector<16x128xf32>
    %c0_4 = arith.constant 0 : index
    %c0_5 = arith.constant 0 : index
    %5 = vector.load %arg4[%c0_4, %c0_5] : memref<128x128xf32, #tpu.memory_space<vmem>>, vector<128x128xf32>
    %cst = arith.constant dense<0.000000e+00> : vector<16x128xf32>
    %6 = tpu.matmul %4, %5, %cst {dimension_numbers = #tpu.dot_dimension_numbers<[1], [0], [0], [1], [0, 0, 1, 1], [], []>} : vector<16x128xf32>, vector<128x128xf32>, vector<16x128xf32> -> vector<16x128xf32>
    %7 = arith.addf %3, %6 : vector<16x128xf32>
    %c0_6 = arith.constant 0 : index
    %c0_7 = arith.constant 0 : index
    %8 = vector.load %arg8[%c0_6, %c0_7] : memref<16x128xf32, #tpu.memory_space<vmem>>, vector<16x128xf32>
    tpu.vector_store %arg8[%c0_6, %c0_7], %7 {strides = array<i32>} : memref<16x128xf32, #tpu.memory_space<vmem>>, vector<16x128xf32>,
    %c0_i32_8 = arith.constant 0 : i32
    %9 = arith.cmpi eq, %arg2, %c0_i32_8 : i32
    %10 = arith.extui %9 : i1 to i32
    %c0_i32_9 = arith.constant 0 : i32
    %11 = arith.cmpi ne, %10, %c0_i32_9 : i32
    scf.if %11 {
      %c0_10 = arith.constant 0 : index
      %c0_11 = arith.constant 0 : index
      %12 = vector.load %arg8[%c0_10, %c0_11] : memref<16x128xf32, #tpu.memory_space<vmem>>, vector<16x128xf32>
      %c0_12 = arith.constant 0 : index
      %c0_13 = arith.constant 0 : index
      %13 = vector.load %arg5[%c0_12, %c0_13] : memref<1x128xf32, #tpu.memory_space<vmem>>, vector<1x128xf32>
      %14 = vector.broadcast %13 : vector<1x128xf32> to vector<16x128xf32>
      %15 = arith.mulf %12, %14 : vector<16x128xf32>
      %c0_14 = arith.constant 0 : index
      %c0_15 = arith.constant 0 : index
      %16 = vector.load %arg6[%c0_14, %c0_15] : memref<1x128xf32, #tpu.memory_space<vmem>>, vector<1x128xf32>
      %17 = vector.broadcast %16 : vector<1x128xf32> to vector<16x128xf32>
      %18 = arith.addf %15, %17 : vector<16x128xf32>
      %c0_16 = arith.constant 0 : index
      %c0_17 = arith.constant 0 : index
      %19 = vector.load %arg7[%c0_16, %c0_17] : memref<16x128xf32, #tpu.memory_space<vmem>>, vector<16x128xf32>
      tpu.vector_store %arg7[%c0_16, %c0_17], %18 {strides = array<i32>} : memref<16x128xf32, #tpu.memory_space<vmem>>, vector<16x128xf32>,
    } else {
    }
    return
  }
  func.func @transform_0(%arg0: i32, %arg1: i32, %arg2: i32) -> (i32, i32) {
    %c0_i32 = arith.constant 0 : i32
    return %arg0, %arg2 : i32, i32
  }
  func.func @transform_1(%arg0: i32, %arg1: i32, %arg2: i32) -> (i32, i32) {
    %c0_i32 = arith.constant 0 : i32
    return %arg2, %arg1 : i32, i32
  }
  func.func @transform_2(%arg0: i32, %arg1: i32, %arg2: i32) -> (i32, i32) {
    %c0_i32 = arith.constant 0 : i32
    %c0_i32_0 = arith.constant 0 : i32
    return %c0_i32, %arg1 : i32, i32
  }
  func.func @transform_3(%arg0: i32, %arg1: i32, %arg2: i32) -> (i32, i32) {
    %c0_i32 = arith.constant 0 : i32
    %c0_i32_0 = arith.constant 0 : i32
    return %c0_i32, %arg1 : i32, i32
  }
  func.func @transform_4(%arg0: i32, %arg1: i32, %arg2: i32) -> (i32, i32) {
    %c0_i32 = arith.constant 0 : i32
    return %arg0, %arg1 : i32, i32
  }
}

</mosaic_0001>

<bundles_post_ra>
// kernel: tpu_custom_call.1
= control target key start
LH: loop header
LB: loop body
LE: loop exit
PB: predicated region body
PF: predicated region fallthrough
CT: control target
= control target key end

     0   :  { %9 = vsyncpa [#allocation4], 0  ;;  %s439_s0 = inlined_call_operand.hbm [shape: f32[16,128], index: 0, kind: input, shape index: {}]   ;;  %s440_s1 = inlined_call_operand.hbm [shape: f32[128,128], index: 1, kind: input, shape index: {}]   ;;  %s441_s2 = inlined_call_operand.vmem [shape: f32[1,128], index: 2, kind: input, shape index: {}]   ;;  %s442_s3 = inlined_call_operand.vmem [shape: f32[1,128], index: 3, kind: input, shape index: {}]   ;;  %s443_s4 = inlined_call_operand.hbm [shape: f32[16,128], index: 4, kind: output, shape index: {}]  }
   0x1   :  { %10 = vsyncpa [#allocation7], 0 }
   0x2   :  { %11 = vsyncpa [#allocation5], 0  ;;  %s358_s15 = smov [#allocation3]   ;;  %s286_s19 = scalar_lea.hbm %s439_s0, 256 }
   0x3   :  { %s17_s16 = sshll.u32 %s358_s15, 4  ;;  %p287_p0 = scmp.ne.s32.totalorder %s439_s0, %s286_s19  ;;  %s18_s16 = int_to_ptr.vmem [resolvable:$true] %s17_s16 }
   0x4   :  { %p290_p1 = scmp.lt.u32.totalorder %s286_s19, %s439_s0 }
   0x6   :  { %p292_p2 = pnand %p290_p1, %p287_p0 }
   0x8   :  { %295 = shalt.err (!%p292_p2)
}
   0x9   :  { %s296_s24 = scalar_lea.vmem %s18_s16, 256  ;;  %p301_p4 = scmp.lt.s32.totalorder %s18_s16, %s18_s16 }
   0xa   :  { %p297_p3 = scmp.ne.s32.totalorder %s18_s16, %s296_s24  ;;  %p302_p5 = scmp.lt.s32.totalorder %s296_s24, %s296_s24 }
   0xc   :  { %p303_p6 = por %p302_p5, %p301_p4 }
   0xe   :  { %p304_p7 = pnand %p303_p6, %p297_p3 }
  0x10   :  { %307 = shalt.err (!%p304_p7)
}
  0x11   :  { %s359_s25 = smov 128   ;;  %s360_s26 = smov 8  }
  0x12   :  { %23 = dma.hbm_to_vmem [thread:$0]  %s439_s0, 256, %s18_s16, [#allocation4], %s359_s25, %s359_s25, %s360_s26  }
  0x13   :  { %s361_s29 = smov [#allocation6]   ;;  %s308_s7 = scalar_lea.hbm %s440_s1, 2048 }
  0x14   :  { %s29_s30 = sshll.u32 %s361_s29, 4  ;;  %p309_p8 = scmp.ne.s32.totalorder %s440_s1, %s308_s7  ;;  %s30_s30 = int_to_ptr.vmem [resolvable:$true] %s29_s30 }
  0x15   :  { %p312_p9 = scmp.lt.u32.totalorder %s308_s7, %s440_s1 }
  0x17   :  { %p314_p10 = pnand %p312_p9, %p309_p8 }
  0x19   :  { %317 = shalt.err (!%p314_p10)
}
  0x1a   :  { %s318_s12 = scalar_lea.vmem %s30_s30, 2048  ;;  %p323_p12 = scmp.lt.s32.totalorder %s30_s30, %s30_s30 }
  0x1b   :  { %p319_p11 = scmp.ne.s32.totalorder %s30_s30, %s318_s12  ;;  %p324_p13 = scmp.lt.s32.totalorder %s318_s12, %s318_s12 }
  0x1d   :  { %p325_p0 = por %p324_p13, %p323_p12 }
  0x1f   :  { %p326_p1 = pnand %p325_p0, %p319_p11 }
  0x21   :  { %329 = shalt.err (!%p326_p1)
}
  0x22   :  { %35 = dma.hbm_to_vmem [thread:$0]  %s440_s1, 2048, %s30_s30, [#allocation7], %s359_s25, %s359_s25, %s360_s26  }
  0x23   :  { %352 = dma.done.wait [#allocation4], 256  }
  0x24   :  { %353 = vsyncadd [#allocation4], 4294967040 }
  0x25   :  { %354 = dma.done.wait [#allocation7], 2048  }
  0x26   :  { %355 = vsyncadd [#allocation7], 4294965248  ;;  %v56_v0 = vld [vmem:[#allocation6] sm:$0xff]  ;;  %v57_v1 = vld [vmem:[#allocation6 + $0x8] sm:$0xff]  ;;  %s362_s17 = smov [#allocation8]  }
  0x27   :  { %v58_v2 = vld [vmem:[#allocation6 + $0x10] sm:$0xff]  ;;  %v249_v3 = vpack.c.bf16 %v57_v1, %v56_v0  ;;  %v59_v4 = vld [vmem:[#allocation6 + $0x18] sm:$0xff]  ;;  %v60_v6 = vld [vmem:[#allocation6 + $0x20] sm:$0xff]  ;;  %s181_s18 = sshll.u32 %s362_s17, 4  ;;  %s182_s18 = int_to_ptr.vmem [resolvable:$true] %s181_s18 }
  0x28   :  { %v253_v5 = vpack.c.bf16 %v59_v4, %v58_v2  ;;  %v61_v7 = vld [vmem:[#allocation6 + $0x28] sm:$0xff]  ;;  %v54_v9 = vld [vmem:[#allocation3] sm:$0xff]  ;;  %v63_v11 = vld [vmem:[#allocation6 + $0x38] sm:$0xff]  ;;  %s330_s19 = scalar_lea.vmem %s182_s18, 256  ;;  %p335_p3 = scmp.lt.s32.totalorder %s182_s18, %s182_s18 }
  0x29   :  { %250 = vmatprep.subr.bf16.mxu0 %v249_v3  ;;  %v257_v8 = vpack.c.bf16 %v61_v7, %v60_v6  ;;  %v62_v10 = vld [vmem:[#allocation6 + $0x30] sm:$0xff]  ;;  %246 = vmatprep.mubr.f32.mxu0 %v54_v9  ;;  %v64_v13 = vld [vmem:[#allocation6 + $0x40] sm:$0xff]  ;;  %v65_v14 = vld [vmem:[#allocation6 + $0x48] sm:$0xff]  ;;  %p331_p2 = scmp.ne.s32.totalorder %s182_s18, %s330_s19  ;;  %p336_p4 = scmp.lt.s32.totalorder %s330_s19, %s330_s19 }
  0x2a   :  { %252 = vmatpush3.bf16.msra.mxu0 %v249_v3  ;;  %v261_v12 = vpack.c.bf16 %v63_v11, %v62_v10  ;;  %v265_v15 = vpack.c.bf16 %v65_v14, %v64_v13  ;;  %v66_v16 = vld [vmem:[#allocation6 + $0x50] sm:$0xff]  ;;  %v67_v17 = vld [vmem:[#allocation6 + $0x58] sm:$0xff]  ;;  %v68_v19 = vld [vmem:[#allocation6 + $0x60] sm:$0xff] }
  0x2b   :  { %254 = vmatprep.subr.bf16.mxu0 %v253_v5  ;;  %v269_v18 = vpack.c.bf16 %v67_v17, %v66_v16  ;;  %v69_v20 = vld [vmem:[#allocation6 + $0x68] sm:$0xff]  ;;  %v70_v22 = vld [vmem:[#allocation6 + $0x70] sm:$0xff]  ;;  %v71_v23 = vld [vmem:[#allocation6 + $0x78] sm:$0xff]  ;;  %p337_p5 = por %p336_p4, %p335_p3 }
  0x2c   :  { %v273_v21 = vpack.c.bf16 %v69_v20, %v68_v19  ;;  %v277_v24 = vpack.c.bf16 %v71_v23, %v70_v22  ;;  %v55_v25 = vld [vmem:[#allocation3 + $0x8] sm:$0xff]  ;;  %v194_v26 = vld [vmem:[%s441_s2] ss:$0 sm:$0xff] }
  0x2d   :  { %v195_v28 = vld [vmem:[%s442_s3] ss:$0 sm:$0xff]  ;;  %p338_p6 = pnand %p337_p5, %p331_p2 }
  0x2e   :  { %256 = vmatpush3.bf16.msra.mxu0 %v253_v5 }
  0x2f   :  { %258 = vmatprep.subr.bf16.mxu0 %v257_v8 }
  0x32   :  { %260 = vmatpush3.bf16.msra.mxu0 %v257_v8 }
  0x33   :  { %262 = vmatprep.subr.bf16.mxu0 %v261_v12 }
  0x36   :  { %264 = vmatpush3.bf16.msra.mxu0 %v261_v12 }
  0x37   :  { %266 = vmatprep.subr.bf16.mxu0 %v265_v15 }
  0x3a   :  { %268 = vmatpush3.bf16.msra.mxu0 %v265_v15 }
  0x3b   :  { %270 = vmatprep.subr.bf16.mxu0 %v269_v18 }
  0x3e   :  { %272 = vmatpush3.bf16.msra.mxu0 %v269_v18 }
  0x3f   :  { %274 = vmatprep.subr.bf16.mxu0 %v273_v21 }
  0x42   :  { %276 = vmatpush3.bf16.msra.mxu0 %v273_v21 }
  0x43   :  { %278 = vmatprep.subr.bf16.mxu0 %v277_v24 }
  0x46   :  { %280 = vmatpush3.bf16.msra.mxu0 %v277_v24 }
  0x49   :  { %247 = vmatmul.mubr.f32.vlgmr.msra.gmra.mrb[0].mxu0 %v55_v25 }
 0x11c   :  { %v248_v27 = vpop.f32.mrb[0].mxu0 }
 0x11d   :  { %v164_v29 = vmul.f32 %v248_v27, %v194_v26  ;;  %v138_v30 = vpop.f32.mrb[1].mxu0 }
 0x11e   :  { %v163_v31 = vmul.f32 %v194_v26, %v138_v30 }
 0x11f   :  { %v173_v32 = vadd.f32 %v195_v28, %v164_v29 }
 0x120   :  { %v172_v33 = vadd.f32 %v195_v28, %v163_v31 }
 0x121   :  { %175 = vst [vmem:[#allocation8 + $0x8] sm:$0xff] %v173_v32 }
 0x122   :  { %174 = vst [vmem:[#allocation8] sm:$0xff] %v172_v33 }
 0x123   :  { %341 = shalt.err (!%p338_p6)
}
 0x124   :  { %s342_s3 = scalar_lea.hbm %s443_s4, 256 }
 0x125   :  { %p343_p7 = scmp.ne.s32.totalorder %s443_s4, %s342_s3  ;;  %p346_p8 = scmp.lt.u32.totalorder %s342_s3, %s443_s4 }
 0x127   :  { %p348_p9 = pnand %p346_p8, %p343_p7 }
 0x129   :  { %351 = shalt.err (!%p348_p9)
}
 0x12a   :  { %187 = dma.vmem_to_hbm [thread:$0]  %s182_s18, 256, %s443_s4, [#allocation5], %s359_s25, %s359_s25, %s360_s26  }
 0x12b   :  { %356 = dma.done.wait [#allocation5], 256  }
 0x12c   :  { %357 = vsyncadd [#allocation5], 4294967040 }
 0x12d   :  { %191 = vsyncpa [#allocation4], 1 }
 0x12e   :  { %192 = vsyncpa [#allocation7], 1 }
 0x12f   :  { %193 = vsyncpa [#allocation5], 1 }

</bundles_post_ra>
